<compile_context>
chip_gen: v7x
topology: tpu7x:2x2x1
jax: 0.10.0
libtpu: 0.0.40
codegen_flags: <defaults>
</compile_context>

<pallas_src>
import functools
import math

import jax
import jax.numpy as jnp
import numpy as np
from jax import lax
from jax.experimental import pallas as pl
from jax.experimental.pallas import tpu as pltpu


# ----------------------------- kernel helpers ------------------------------

def _layernorm(x, g, b, eps=1e-5):
    # x: (R, W) f32, g/b: (1, W) f32 — matches torch.nn.LayerNorm(width), eps=1e-5
    mu = jnp.mean(x, axis=-1, keepdims=True)
    var = jnp.mean(jnp.square(x - mu), axis=-1, keepdims=True)
    return (x - mu) * lax.rsqrt(var + eps) * g + b


def _gelu_exact(x):
    # torch.nn.GELU() default (approximate='none') — exact erf formulation
    return 0.5 * x * (1.0 + lax.erf(x / math.sqrt(2.0)))


# ------------------------------- the kernel --------------------------------

def _resblock_kernel(n_heads, has_mask, *refs):
    if has_mask:
        (x_ref, mask_ref,
         ln1g_ref, ln1b_ref, wqkv_ref, bqkv_ref, wo_ref, bo_ref,
         ln2g_ref, ln2b_ref, wfc_ref, bfc_ref, wp_ref, bp_ref,
         out_ref) = refs
    else:
        (x_ref,
         ln1g_ref, ln1b_ref, wqkv_ref, bqkv_ref, wo_ref, bo_ref,
         ln2g_ref, ln2b_ref, wfc_ref, bfc_ref, wp_ref, bp_ref,
         out_ref) = refs
        mask_ref = None

    xb = x_ref[...]                         # (Bb, T, W) f32
    Bb, T, W = xb.shape
    H = n_heads
    C = W // H
    bf16 = jnp.bfloat16
    x = xb.reshape(Bb * T, W)               # rows fill sublanes / MXU M

    # -------- attention branch: x + c_proj(attn(c_qkv(ln_1(x)))) ------------
    h = _layernorm(x, ln1g_ref[...], ln1b_ref[...])

    # fused QKV matmul (1/sqrt(sqrt(C)) already folded into q/k weight & bias)
    qkv = jnp.dot(h.astype(bf16), wqkv_ref[...],
                  preferred_element_type=jnp.float32) + bqkv_ref[...]   # (Bb*T, 3W)

    def to_heads(z):                        # (Bb*T, W) -> (Bb*H, T, C), one relayout
        z = z.reshape(Bb, T, H, C)
        return jnp.swapaxes(z, 1, 2).reshape(Bb * H, T, C)

    q = to_heads(qkv[:, :W])
    k = to_heads(qkv[:, W:2 * W])
    v = to_heads(qkv[:, 2 * W:])

    # single-batch-dim matmuls -> clean MXU tiles
    scores = jnp.einsum('btc,bsc->bts', q.astype(bf16), k.astype(bf16),
                        preferred_element_type=jnp.float32)             # (Bb*H, T, T)
    if has_mask:
        bias = jnp.broadcast_to(mask_ref[...], (Bb, H, T)).reshape(Bb * H, 1, T)
        scores = scores + bias

    # TODO(synk): for large n_ctx, tile the key axis with an online softmax
    # (flash-style) so the (Bb*H, T, T) f32 scores never fully materialize.
    m = jnp.max(scores, axis=-1, keepdims=True)
    e = jnp.exp(scores - m)
    p = e * pl.reciprocal(jnp.sum(e, axis=-1, keepdims=True), approx=True)

    attn = jnp.einsum('bts,bsc->btc', p.astype(bf16), v.astype(bf16),
                      preferred_element_type=jnp.float32)               # (Bb*H, T, C)
    attn = jnp.swapaxes(attn.reshape(Bb, H, T, C), 1, 2).reshape(Bb * T, W)
    attn = jnp.dot(attn.astype(bf16), wo_ref[...],
                   preferred_element_type=jnp.float32) + bo_ref[...]
    x = x + attn

    # -------- MLP branch: x + c_proj(gelu(c_fc(ln_2(x)))) -------------------
    # TODO(synk): for width >= 1024, K-tile the 4W hidden dim so fc/proj
    # weights and the (rows, 4W) f32 hidden need not be fully VMEM-resident.
    h2 = _layernorm(x, ln2g_ref[...], ln2b_ref[...])
    h2 = jnp.dot(h2.astype(bf16), wfc_ref[...],
                 preferred_element_type=jnp.float32) + bfc_ref[...]
    h2 = _gelu_exact(h2)                    # exact erf (torch nn.GELU default)
    h2 = jnp.dot(h2.astype(bf16), wp_ref[...],
                 preferred_element_type=jnp.float32) + bp_ref[...]

    out_ref[...] = (x + h2).reshape(Bb, T, W)


# ------------------------------ wrapper / glue ------------------------------

def init_params(key, width):
    ks = jax.random.split(key, 6)
    nrm = lambda k, shape: jax.random.normal(k, shape, jnp.float32) * 0.02
    return dict(
        qkv_w=nrm(ks[0], (3 * width, width)),       # nn.Linear(width, 3*width)
        qkv_b=nrm(ks[1], (3 * width,)),
        attn_proj_w=nrm(ks[2], (width, width)),     # nn.Linear(width, width)
        attn_proj_b=jnp.zeros((width,), jnp.float32),
        ln1_g=jnp.ones((width,), jnp.float32),
        ln1_b=jnp.zeros((width,), jnp.float32),
        fc_w=nrm(ks[3], (4 * width, width)),        # nn.Linear(width, 4*width)
        fc_b=nrm(ks[4], (4 * width,)),
        mlp_proj_w=nrm(ks[5], (width, 4 * width)),  # nn.Linear(4*width, width)
        mlp_proj_b=jnp.zeros((width,), jnp.float32),
        ln2_g=jnp.ones((width,), jnp.float32),
        ln2_b=jnp.zeros((width,), jnp.float32),
    )


def _vmem_capacity_bytes():
    # Per-generation VMEM capacity (128 MiB on v5e/v6e, 64 MiB on v7x).
    try:
        cap = int(pltpu.get_tpu_info().vmem_capacity_bytes)
        if cap > 0:
            return cap
    except Exception:
        pass
    return 64 << 20          # conservative fallback, safe on every generation


def _pick_batch_block(B, T, W, H, vmem_budget):
    """Largest divisor of B whose per-step working set fits the VMEM budget.

    Capped at B//2 (when B > 1) so the grid has >= 2 steps: both v7x
    TensorCores get work and the input/output DMA pipeline stays live.
    Stops growing once Bblk*T >= 512 (MXU M dimension already saturated).
    """
    weight_bytes = 24 * W * W + 64 * W            # resident bf16 weights + f32 rows

    def footprint(bb):
        rows = bb * T
        io = 4 * rows * W * 4                     # double-buffered x-in + out blocks
        act = rows * 17 * W * 4                   # h, qkv(+bf16), attn, MLP hidden, residuals
        act += 12 * bb * H * T * T                # scores / exp / probs (f32)
        return weight_bytes + io + act

    cap = B if B == 1 else B // 2
    best = 1
    for cand in range(1, cap + 1):
        if B % cand:
            continue
        if footprint(cand) > vmem_budget:
            break
        best = cand
        if cand * T >= 512:
            break
    return best


def residual_attention_block(x, params, heads, key_padding_mask=None):
    B, T, W = x.shape
    H = heads
    C = W // H
    scale = 1.0 / math.sqrt(math.sqrt(C))   # matches 1/sqrt(sqrt(attn_ch))

    # PyTorch qkv Linear rows are per-head [q(C)|k(C)|v(C)] blocks of size 3C.
    # Re-pack into one head-major fused weight; fold the attention scale into
    # the q/k weights AND biases (scale is applied after the bias add in torch).
    qw = params['qkv_w'].reshape(H, 3 * C, W)
    qb = params['qkv_b'].reshape(H, 3 * C)
    wq = qw[:, :C, :].reshape(W, W) * scale
    wk = qw[:, C:2 * C, :].reshape(W, W) * scale
    wv = qw[:, 2 * C:, :].reshape(W, W)
    bq = qb[:, :C].reshape(W) * scale
    bk = qb[:, C:2 * C].reshape(W) * scale
    bv = qb[:, 2 * C:].reshape(W)
    wqkv_t = jnp.concatenate([wq, wk, wv], axis=0).T          # (W, 3W)
    bqkv = jnp.concatenate([bq, bk, bv], axis=0)               # (3W,)

    wo_t = params['attn_proj_w'].T                             # (W, W)
    wfc_t = params['fc_w'].T                                   # (W, 4W)
    wp_t = params['mlp_proj_w'].T                              # (4W, W)

    row = lambda a: a.reshape(1, -1).astype(jnp.float32)
    w16 = lambda a: a.astype(jnp.bfloat16)                     # MXU-native weights

    weight_args = (row(params['ln1_g']), row(params['ln1_b']),
                   w16(wqkv_t), row(bqkv),
                   w16(wo_t), row(params['attn_proj_b']),
                   row(params['ln2_g']), row(params['ln2_b']),
                   w16(wfc_t), row(params['fc_b']),
                   w16(wp_t), row(params['mlp_proj_b']))

    # VMEM budget from real capacity, leaving headroom for Mosaic scratch.
    capacity = _vmem_capacity_bytes()
    headroom = max(8 << 20, capacity // 8)
    budget = capacity - headroom

    Bblk = _pick_batch_block(B, T, W, H, budget)
    grid = (B // Bblk,)

    # Weights/biases: whole array resident in VMEM once (no double buffering).
    resident = pl.BlockSpec(memory_space=pltpu.MemorySpace.VMEM)
    x_spec = pl.BlockSpec((Bblk, T, W), lambda b: (b, 0, 0))

    x_f32 = x.astype(jnp.float32)
    has_mask = key_padding_mask is not None
    if has_mask:
        # Large finite negative bias instead of -inf: identical softmax when a
        # row has >=1 valid key, and no NaN when a row is fully masked.
        mask_bias = jnp.where(key_padding_mask, -1e30, 0.0
                              ).astype(jnp.float32).reshape(B, 1, T)
        args = (x_f32, mask_bias) + weight_args
        in_specs = ([x_spec, pl.BlockSpec((Bblk, 1, T), lambda b: (b, 0, 0))]
                    + [resident] * len(weight_args))
    else:
        args = (x_f32,) + weight_args
        in_specs = [x_spec] + [resident] * len(weight_args)

    return pl.pallas_call(
        functools.partial(_resblock_kernel, heads, has_mask),
        out_shape=jax.ShapeDtypeStruct((B, T, W), jnp.float32),
        grid=grid,
        in_specs=in_specs,
        out_specs=pl.BlockSpec((Bblk, T, W), lambda b: (b, 0, 0)),
        input_output_aliases={0: 0},        # out block reuses the f32 x buffer
        compiler_params=pltpu.CompilerParams(
            dimension_semantics=("parallel",),   # batch blocks independent -> 2 TCs on v7x
            vmem_limit_bytes=int(budget)),
    )(*args)


# ------------------------- pure-JAX reference check -------------------------

def _reference(x, params, heads, key_padding_mask=None):
    B, T, W = x.shape
    C = W // heads
    scale = 1.0 / math.sqrt(math.sqrt(C))

    def ln(x, g, b):
        mu = jnp.mean(x, -1, keepdims=True)
        var = jnp.mean((x - mu) ** 2, -1, keepdims=True)
        return (x - mu) / jnp.sqrt(var + 1e-5) * g + b

    h = ln(x, params['ln1_g'], params['ln1_b'])
    qkv = h @ params['qkv_w'].T + params['qkv_b']          # (B, T, 3W)
    qkv = qkv.reshape(B, T, heads, 3 * C)
    q, k, v = qkv[..., :C], qkv[..., C:2 * C], qkv[..., 2 * C:]
    w = jnp.einsum('bthc,bshc->bhts', q * scale, k * scale)
    if key_padding_mask is not None:
        w = jnp.where(key_padding_mask[:, None, None, :], -jnp.inf, w)
    w = jax.nn.softmax(w.astype(jnp.float32), axis=-1)
    attn = jnp.einsum('bhts,bshc->bthc', w, v).reshape(B, T, W)
    attn = attn @ params['attn_proj_w'].T + params['attn_proj_b']
    x = x + attn
    h2 = ln(x, params['ln2_g'], params['ln2_b'])
    h2 = h2 @ params['fc_w'].T + params['fc_b']
    h2 = jax.nn.gelu(h2, approximate=False)
    h2 = h2 @ params['mlp_proj_w'].T + params['mlp_proj_b']
    return x + h2


if __name__ == "__main__":
    B, T, W, HEADS = 2, 8, 32, 4      # (batch, n_ctx, width, heads)

    key = jax.random.PRNGKey(0)
    kx, kp = jax.random.split(key)
    x = jax.random.normal(kx, (B, T, W), jnp.float32)
    params = init_params(kp, W)

    # mask: every row keeps at least one valid key (so -inf vs -1e30 agree)
    mask = jnp.zeros((B, T), jnp.bool_).at[:, -2:].set(True)

    # references first (kernel aliases its f32 input buffer)
    ref = jax.block_until_ready(_reference(x, params, HEADS))
    ref_m = jax.block_until_ready(_reference(x, params, HEADS, key_padding_mask=mask))

    out = jax.block_until_ready(
        residual_attention_block(x, params, HEADS, key_padding_mask=None))
    out_m = jax.block_until_ready(
        residual_attention_block(x, params, HEADS, key_padding_mask=mask))

    # bf16 MXU operands + approx reciprocal => slightly looser tolerance than pure f32
    np.testing.assert_allclose(np.asarray(out), np.asarray(ref),
                               rtol=2e-2, atol=2e-2)
    np.testing.assert_allclose(np.asarray(out_m), np.asarray(ref_m),
                               rtol=2e-2, atol=2e-2)

    print("KERNEL_OK")
</pallas_src>

<mosaic_0001>
module attributes {stable_mosaic.version = 11 : i64} {
  func.func @_resblock_kernel(%arg0: i32, %arg1: memref<1x8x32xf32, #tpu.memory_space<vmem>>, %arg2: memref<1x32xf32, #tpu.memory_space<vmem>>, %arg3: memref<1x32xf32, #tpu.memory_space<vmem>>, %arg4: memref<32x96xbf16, #tpu.memory_space<vmem>>, %arg5: memref<1x96xf32, #tpu.memory_space<vmem>>, %arg6: memref<32x32xbf16, #tpu.memory_space<vmem>>, %arg7: memref<1x32xf32, #tpu.memory_space<vmem>>, %arg8: memref<1x32xf32, #tpu.memory_space<vmem>>, %arg9: memref<1x32xf32, #tpu.memory_space<vmem>>, %arg10: memref<32x128xbf16, #tpu.memory_space<vmem>>, %arg11: memref<1x128xf32, #tpu.memory_space<vmem>>, %arg12: memref<128x32xbf16, #tpu.memory_space<vmem>>, %arg13: memref<1x32xf32, #tpu.memory_space<vmem>>, %arg14: memref<1x8x32xf32, #tpu.memory_space<vmem>>) attributes {dimension_semantics = [#tpu.dimension_semantics<parallel>], iteration_bounds = array<i64: 2>, scalar_prefetch = 0 : i64, scratch_operands = 0 : i64, tpu.core_type = #tpu.core_type<tc>, window_params = [{transform_indices = @transform_0, window_bounds = array<i64: 1, 8, 32>}, {pipeline_mode = #tpu.pipeline_mode<synchronous>, transform_indices = @transform_1, window_bounds = array<i64: 1, 32>}, {pipeline_mode = #tpu.pipeline_mode<synchronous>, transform_indices = @transform_2, window_bounds = array<i64: 1, 32>}, {pipeline_mode = #tpu.pipeline_mode<synchronous>, transform_indices = @transform_3, window_bounds = array<i64: 32, 96>}, {pipeline_mode = #tpu.pipeline_mode<synchronous>, transform_indices = @transform_4, window_bounds = array<i64: 1, 96>}, {pipeline_mode = #tpu.pipeline_mode<synchronous>, transform_indices = @transform_5, window_bounds = array<i64: 32, 32>}, {pipeline_mode = #tpu.pipeline_mode<synchronous>, transform_indices = @transform_6, window_bounds = array<i64: 1, 32>}, {pipeline_mode = #tpu.pipeline_mode<synchronous>, transform_indices = @transform_7, window_bounds = array<i64: 1, 32>}, {pipeline_mode = #tpu.pipeline_mode<synchronous>, transform_indices = @transform_8, window_bounds = array<i64: 1, 32>}, {pipeline_mode = #tpu.pipeline_mode<synchronous>, transform_indices = @transform_9, window_bounds = array<i64: 32, 128>}, {pipeline_mode = #tpu.pipeline_mode<synchronous>, transform_indices = @transform_10, window_bounds = array<i64: 1, 128>}, {pipeline_mode = #tpu.pipeline_mode<synchronous>, transform_indices = @transform_11, window_bounds = array<i64: 128, 32>}, {pipeline_mode = #tpu.pipeline_mode<synchronous>, transform_indices = @transform_12, window_bounds = array<i64: 1, 32>}, {transform_indices = @transform_13, window_bounds = array<i64: 1, 8, 32>}]} {
    %c0 = arith.constant 0 : index
    %c0_0 = arith.constant 0 : index
    %c0_1 = arith.constant 0 : index
    %0 = vector.load %arg1[%c0, %c0_0, %c0_1] : memref<1x8x32xf32, #tpu.memory_space<vmem>>, vector<1x8x32xf32>
    %1 = vector.shape_cast %0 : vector<1x8x32xf32> to vector<8x32xf32>
    %c0_2 = arith.constant 0 : index
    %c0_3 = arith.constant 0 : index
    %2 = vector.load %arg2[%c0_2, %c0_3] : memref<1x32xf32, #tpu.memory_space<vmem>>, vector<1x32xf32>
    %c0_4 = arith.constant 0 : index
    %c0_5 = arith.constant 0 : index
    %3 = vector.load %arg3[%c0_4, %c0_5] : memref<1x32xf32, #tpu.memory_space<vmem>>, vector<1x32xf32>
    %cst = arith.constant dense<0.000000e+00> : vector<8xf32>
    %4 = vector.multi_reduction <add>, %1, %cst [1] : vector<8x32xf32> to vector<8xf32>
    %5 = vector.shape_cast %4 : vector<8xf32> to vector<8x1xf32>
    %cst_6 = arith.constant 3.200000e+01 : f32
    %6 = vector.broadcast %cst_6 : f32 to vector<8x1xf32>
    %7 = arith.divf %5, %6 : vector<8x1xf32>
    %8 = vector.broadcast %7 : vector<8x1xf32> to vector<8x32xf32>
    %9 = arith.subf %1, %8 : vector<8x32xf32>
    %10 = arith.mulf %9, %9 : vector<8x32xf32>
    %cst_7 = arith.constant dense<0.000000e+00> : vector<8xf32>
    %11 = vector.multi_reduction <add>, %10, %cst_7 [1] : vector<8x32xf32> to vector<8xf32>
    %12 = vector.shape_cast %11 : vector<8xf32> to vector<8x1xf32>
    %cst_8 = arith.constant 3.200000e+01 : f32
    %13 = vector.broadcast %cst_8 : f32 to vector<8x1xf32>
    %14 = arith.divf %12, %13 : vector<8x1xf32>
    %15 = vector.broadcast %7 : vector<8x1xf32> to vector<8x32xf32>
    %16 = arith.subf %1, %15 : vector<8x32xf32>
    %cst_9 = arith.constant 9.99999974E-6 : f32
    %17 = vector.broadcast %cst_9 : f32 to vector<8x1xf32>
    %18 = arith.addf %14, %17 : vector<8x1xf32>
    %19 = math.rsqrt %18 : vector<8x1xf32>
    %20 = vector.broadcast %19 : vector<8x1xf32> to vector<8x32xf32>
    %21 = arith.mulf %16, %20 : vector<8x32xf32>
    %22 = vector.broadcast %2 : vector<1x32xf32> to vector<8x32xf32>
    %23 = arith.mulf %21, %22 : vector<8x32xf32>
    %24 = vector.broadcast %3 : vector<1x32xf32> to vector<8x32xf32>
    %25 = arith.addf %23, %24 : vector<8x32xf32>
    %26 = arith.truncf %25 : vector<8x32xf32> to vector<8x32xbf16>
    %c0_10 = arith.constant 0 : index
    %c0_11 = arith.constant 0 : index
    %27 = vector.load %arg4[%c0_10, %c0_11] : memref<32x96xbf16, #tpu.memory_space<vmem>>, vector<32x96xbf16>
    %cst_12 = arith.constant dense<0.000000e+00> : vector<8x96xf32>
    %28 = tpu.matmul %26, %27, %cst_12 {dimension_numbers = #tpu.dot_dimension_numbers<[1], [0], [0], [1], [0, 0, 1, 1], [], []>} : vector<8x32xbf16>, vector<32x96xbf16>, vector<8x96xf32> -> vector<8x96xf32>
    %c0_13 = arith.constant 0 : index
    %c0_14 = arith.constant 0 : index
    %29 = vector.load %arg5[%c0_13, %c0_14] : memref<1x96xf32, #tpu.memory_space<vmem>>, vector<1x96xf32>
    %30 = vector.broadcast %29 : vector<1x96xf32> to vector<8x96xf32>
    %31 = arith.addf %28, %30 : vector<8x96xf32>
    %32 = vector.extract_strided_slice %31 {offsets = [0, 0], sizes = [8, 32], strides = [1, 1]} : vector<8x96xf32> to vector<8x32xf32>
    %33 = vector.shape_cast %32 : vector<8x32xf32> to vector<1x8x4x8xf32>
    %34 = tpu.transpose %33, [0, 2, 1, 3] : vector<1x8x4x8xf32> -> vector<1x4x8x8xf32>
    %35 = vector.shape_cast %34 : vector<1x4x8x8xf32> to vector<4x8x8xf32>
    %36 = vector.extract_strided_slice %31 {offsets = [0, 32], sizes = [8, 32], strides = [1, 1]} : vector<8x96xf32> to vector<8x32xf32>
    %37 = vector.shape_cast %36 : vector<8x32xf32> to vector<1x8x4x8xf32>
    %38 = tpu.transpose %37, [0, 2, 1, 3] : vector<1x8x4x8xf32> -> vector<1x4x8x8xf32>
    %39 = vector.shape_cast %38 : vector<1x4x8x8xf32> to vector<4x8x8xf32>
    %40 = vector.extract_strided_slice %31 {offsets = [0, 64], sizes = [8, 32], strides = [1, 1]} : vector<8x96xf32> to vector<8x32xf32>
    %41 = vector.shape_cast %40 : vector<8x32xf32> to vector<1x8x4x8xf32>
    %42 = tpu.transpose %41, [0, 2, 1, 3] : vector<1x8x4x8xf32> -> vector<1x4x8x8xf32>
    %43 = vector.shape_cast %42 : vector<1x4x8x8xf32> to vector<4x8x8xf32>
    %44 = arith.truncf %35 : vector<4x8x8xf32> to vector<4x8x8xbf16>
    %45 = arith.truncf %39 : vector<4x8x8xf32> to vector<4x8x8xbf16>
    "tpu.trace_start"() <{level = 10 : i32, message = "btc,bsc->bts"}> : () -> ()
    %cst_15 = arith.constant dense<0.000000e+00> : vector<4x8x8xf32>
    %46 = tpu.matmul %44, %45, %cst_15 {dimension_numbers = #tpu.dot_dimension_numbers<[2], [2], [1], [1], [0, 0, 0, 1, 1, 1], [0], [0]>} : vector<4x8x8xbf16>, vector<4x8x8xbf16>, vector<4x8x8xf32> -> vector<4x8x8xf32>
    "tpu.trace_stop"() : () -> ()
    %cst_16 = arith.constant dense<0xFF800000> : vector<4x8xf32>
    %47 = vector.multi_reduction <maximumf>, %46, %cst_16 [2] : vector<4x8x8xf32> to vector<4x8xf32>
    %48 = vector.shape_cast %47 : vector<4x8xf32> to vector<4x8x1xf32>
    %49 = vector.broadcast %48 : vector<4x8x1xf32> to vector<4x8x8xf32>
    %50 = arith.subf %46, %49 : vector<4x8x8xf32>
    %51 = math.exp %50 : vector<4x8x8xf32>
    %cst_17 = arith.constant dense<0.000000e+00> : vector<4x8xf32>
    %52 = vector.multi_reduction <add>, %51, %cst_17 [2] : vector<4x8x8xf32> to vector<4x8xf32>
    %53 = vector.shape_cast %52 : vector<4x8xf32> to vector<4x8x1xf32>
    %54 = tpu.reciprocal %53 {approx = true} : vector<4x8x1xf32> -> vector<4x8x1xf32>
    %55 = vector.broadcast %54 : vector<4x8x1xf32> to vector<4x8x8xf32>
    %56 = arith.mulf %51, %55 : vector<4x8x8xf32>
    %57 = arith.truncf %56 : vector<4x8x8xf32> to vector<4x8x8xbf16>
    %58 = arith.truncf %43 : vector<4x8x8xf32> to vector<4x8x8xbf16>
    "tpu.trace_start"() <{level = 10 : i32, message = "bts,bsc->btc"}> : () -> ()
    %cst_18 = arith.constant dense<0.000000e+00> : vector<4x8x8xf32>
    %59 = tpu.matmul %57, %58, %cst_18 {dimension_numbers = #tpu.dot_dimension_numbers<[2], [1], [1], [2], [0, 0, 0, 1, 1, 2], [0], [0]>} : vector<4x8x8xbf16>, vector<4x8x8xbf16>, vector<4x8x8xf32> -> vector<4x8x8xf32>
    "tpu.trace_stop"() : () -> ()
    %60 = vector.shape_cast %59 : vector<4x8x8xf32> to vector<1x4x8x8xf32>
    %61 = tpu.transpose %60, [0, 2, 1, 3] : vector<1x4x8x8xf32> -> vector<1x8x4x8xf32>
    %62 = vector.shape_cast %61 : vector<1x8x4x8xf32> to vector<8x32xf32>
    %63 = arith.truncf %62 : vector<8x32xf32> to vector<8x32xbf16>
    %c0_19 = arith.constant 0 : index
    %c0_20 = arith.constant 0 : index
    %64 = vector.load %arg6[%c0_19, %c0_20] : memref<32x32xbf16, #tpu.memory_space<vmem>>, vector<32x32xbf16>
    %cst_21 = arith.constant dense<0.000000e+00> : vector<8x32xf32>
    %65 = tpu.matmul %63, %64, %cst_21 {dimension_numbers = #tpu.dot_dimension_numbers<[1], [0], [0], [1], [0, 0, 1, 1], [], []>} : vector<8x32xbf16>, vector<32x32xbf16>, vector<8x32xf32> -> vector<8x32xf32>
    %c0_22 = arith.constant 0 : index
    %c0_23 = arith.constant 0 : index
    %66 = vector.load %arg7[%c0_22, %c0_23] : memref<1x32xf32, #tpu.memory_space<vmem>>, vector<1x32xf32>
    %67 = vector.broadcast %66 : vector<1x32xf32> to vector<8x32xf32>
    %68 = arith.addf %65, %67 : vector<8x32xf32>
    %69 = arith.addf %1, %68 : vector<8x32xf32>
    %c0_24 = arith.constant 0 : index
    %c0_25 = arith.constant 0 : index
    %70 = vector.load %arg8[%c0_24, %c0_25] : memref<1x32xf32, #tpu.memory_space<vmem>>, vector<1x32xf32>
    %c0_26 = arith.constant 0 : index
    %c0_27 = arith.constant 0 : index
    %71 = vector.load %arg9[%c0_26, %c0_27] : memref<1x32xf32, #tpu.memory_space<vmem>>, vector<1x32xf32>
    %cst_28 = arith.constant dense<0.000000e+00> : vector<8xf32>
    %72 = vector.multi_reduction <add>, %69, %cst_28 [1] : vector<8x32xf32> to vector<8xf32>
    %73 = vector.shape_cast %72 : vector<8xf32> to vector<8x1xf32>
    %cst_29 = arith.constant 3.200000e+01 : f32
    %74 = vector.broadcast %cst_29 : f32 to vector<8x1xf32>
    %75 = arith.divf %73, %74 : vector<8x1xf32>
    %76 = vector.broadcast %75 : vector<8x1xf32> to vector<8x32xf32>
    %77 = arith.subf %69, %76 : vector<8x32xf32>
    %78 = arith.mulf %77, %77 : vector<8x32xf32>
    %cst_30 = arith.constant dense<0.000000e+00> : vector<8xf32>
    %79 = vector.multi_reduction <add>, %78, %cst_30 [1] : vector<8x32xf32> to vector<8xf32>
    %80 = vector.shape_cast %79 : vector<8xf32> to vector<8x1xf32>
    %cst_31 = arith.constant 3.200000e+01 : f32
    %81 = vector.broadcast %cst_31 : f32 to vector<8x1xf32>
    %82 = arith.divf %80, %81 : vector<8x1xf32>
    %83 = vector.broadcast %75 : vector<8x1xf32> to vector<8x32xf32>
    %84 = arith.subf %69, %83 : vector<8x32xf32>
    %cst_32 = arith.constant 9.99999974E-6 : f32
    %85 = vector.broadcast %cst_32 : f32 to vector<8x1xf32>
    %86 = arith.addf %82, %85 : vector<8x1xf32>
    %87 = math.rsqrt %86 : vector<8x1xf32>
    %88 = vector.broadcast %87 : vector<8x1xf32> to vector<8x32xf32>
    %89 = arith.mulf %84, %88 : vector<8x32xf32>
    %90 = vector.broadcast %70 : vector<1x32xf32> to vector<8x32xf32>
    %91 = arith.mulf %89, %90 : vector<8x32xf32>
    %92 = vector.broadcast %71 : vector<1x32xf32> to vector<8x32xf32>
    %93 = arith.addf %91, %92 : vector<8x32xf32>
    %94 = arith.truncf %93 : vector<8x32xf32> to vector<8x32xbf16>
    %c0_33 = arith.constant 0 : index
    %c0_34 = arith.constant 0 : index
    %95 = vector.load %arg10[%c0_33, %c0_34] : memref<32x128xbf16, #tpu.memory_space<vmem>>, vector<32x128xbf16>
    %cst_35 = arith.constant dense<0.000000e+00> : vector<8x128xf32>
    %96 = tpu.matmul %94, %95, %cst_35 {dimension_numbers = #tpu.dot_dimension_numbers<[1], [0], [0], [1], [0, 0, 1, 1], [], []>} : vector<8x32xbf16>, vector<32x128xbf16>, vector<8x128xf32> -> vector<8x128xf32>
    %c0_36 = arith.constant 0 : index
    %c0_37 = arith.constant 0 : index
    %97 = vector.load %arg11[%c0_36, %c0_37] : memref<1x128xf32, #tpu.memory_space<vmem>>, vector<1x128xf32>
    %98 = vector.broadcast %97 : vector<1x128xf32> to vector<8x128xf32>
    %99 = arith.addf %96, %98 : vector<8x128xf32>
    %cst_38 = arith.constant 5.000000e-01 : f32
    %100 = vector.broadcast %cst_38 : f32 to vector<8x128xf32>
    %101 = arith.mulf %100, %99 : vector<8x128xf32>
    %cst_39 = arith.constant 1.41421354 : f32
    %102 = vector.broadcast %cst_39 : f32 to vector<8x128xf32>
    %103 = arith.divf %99, %102 : vector<8x128xf32>
    %104 = math.erf %103 : vector<8x128xf32>
    %cst_40 = arith.constant 1.000000e+00 : f32
    %105 = vector.broadcast %cst_40 : f32 to vector<8x128xf32>
    %106 = arith.addf %105, %104 : vector<8x128xf32>
    %107 = arith.mulf %101, %106 : vector<8x128xf32>
    %108 = arith.truncf %107 : vector<8x128xf32> to vector<8x128xbf16>
    %c0_41 = arith.constant 0 : index
    %c0_42 = arith.constant 0 : index
    %109 = vector.load %arg12[%c0_41, %c0_42] : memref<128x32xbf16, #tpu.memory_space<vmem>>, vector<128x32xbf16>
    %cst_43 = arith.constant dense<0.000000e+00> : vector<8x32xf32>
    %110 = tpu.matmul %108, %109, %cst_43 {dimension_numbers = #tpu.dot_dimension_numbers<[1], [0], [0], [1], [0, 0, 1, 1], [], []>} : vector<8x128xbf16>, vector<128x32xbf16>, vector<8x32xf32> -> vector<8x32xf32>
    %c0_44 = arith.constant 0 : index
    %c0_45 = arith.constant 0 : index
    %111 = vector.load %arg13[%c0_44, %c0_45] : memref<1x32xf32, #tpu.memory_space<vmem>>, vector<1x32xf32>
    %112 = vector.broadcast %111 : vector<1x32xf32> to vector<8x32xf32>
    %113 = arith.addf %110, %112 : vector<8x32xf32>
    %114 = arith.addf %69, %113 : vector<8x32xf32>
    %115 = vector.shape_cast %114 : vector<8x32xf32> to vector<1x8x32xf32>
    %c0_46 = arith.constant 0 : index
    %c0_47 = arith.constant 0 : index
    %c0_48 = arith.constant 0 : index
    %116 = vector.load %arg14[%c0_46, %c0_47, %c0_48] : memref<1x8x32xf32, #tpu.memory_space<vmem>>, vector<1x8x32xf32>
    tpu.vector_store %arg14[%c0_46, %c0_47, %c0_48], %115 {strides = array<i32>} : memref<1x8x32xf32, #tpu.memory_space<vmem>>, vector<1x8x32xf32>,
    return
  }
  func.func @transform_0(%arg0: i32) -> (i32, i32, i32) {
    %c0_i32 = arith.constant 0 : i32
    %c0_i32_0 = arith.constant 0 : i32
    %c0_i32_1 = arith.constant 0 : i32
    return %arg0, %c0_i32, %c0_i32_0 : i32, i32, i32
  }
  func.func @transform_1(%arg0: i32) -> (i32, i32) {
    %c0_i32 = arith.constant 0 : i32
    %c0_i32_0 = arith.constant 0 : i32
    %c0_i32_1 = arith.constant 0 : i32
    return %c0_i32, %c0_i32_0 : i32, i32
  }
  func.func @transform_2(%arg0: i32) -> (i32, i32) {
    %c0_i32 = arith.constant 0 : i32
    %c0_i32_0 = arith.constant 0 : i32
    %c0_i32_1 = arith.constant 0 : i32
    return %c0_i32, %c0_i32_0 : i32, i32
  }
  func.func @transform_3(%arg0: i32) -> (i32, i32) {
    %c0_i32 = arith.constant 0 : i32
    %c0_i32_0 = arith.constant 0 : i32
    %c0_i32_1 = arith.constant 0 : i32
    return %c0_i32, %c0_i32_0 : i32, i32
  }
  func.func @transform_4(%arg0: i32) -> (i32, i32) {
    %c0_i32 = arith.constant 0 : i32
    %c0_i32_0 = arith.constant 0 : i32
    %c0_i32_1 = arith.constant 0 : i32
    return %c0_i32, %c0_i32_0 : i32, i32
  }
  func.func @transform_5(%arg0: i32) -> (i32, i32) {
    %c0_i32 = arith.constant 0 : i32
    %c0_i32_0 = arith.constant 0 : i32
    %c0_i32_1 = arith.constant 0 : i32
    return %c0_i32, %c0_i32_0 : i32, i32
  }
  func.func @transform_6(%arg0: i32) -> (i32, i32) {
    %c0_i32 = arith.constant 0 : i32
    %c0_i32_0 = arith.constant 0 : i32
    %c0_i32_1 = arith.constant 0 : i32
    return %c0_i32, %c0_i32_0 : i32, i32
  }
  func.func @transform_7(%arg0: i32) -> (i32, i32) {
    %c0_i32 = arith.constant 0 : i32
    %c0_i32_0 = arith.constant 0 : i32
    %c0_i32_1 = arith.constant 0 : i32
    return %c0_i32, %c0_i32_0 : i32, i32
  }
  func.func @transform_8(%arg0: i32) -> (i32, i32) {
    %c0_i32 = arith.constant 0 : i32
    %c0_i32_0 = arith.constant 0 : i32
    %c0_i32_1 = arith.constant 0 : i32
    return %c0_i32, %c0_i32_0 : i32, i32
  }
  func.func @transform_9(%arg0: i32) -> (i32, i32) {
    %c0_i32 = arith.constant 0 : i32
    %c0_i32_0 = arith.constant 0 : i32
    %c0_i32_1 = arith.constant 0 : i32
    return %c0_i32, %c0_i32_0 : i32, i32
  }
  func.func @transform_10(%arg0: i32) -> (i32, i32) {
    %c0_i32 = arith.constant 0 : i32
    %c0_i32_0 = arith.constant 0 : i32
    %c0_i32_1 = arith.constant 0 : i32
    return %c0_i32, %c0_i32_0 : i32, i32
  }
  func.func @transform_11(%arg0: i32) -> (i32, i32) {
    %c0_i32 = arith.constant 0 : i32
    %c0_i32_0 = arith.constant 0 : i32
    %c0_i32_1 = arith.constant 0 : i32
    return %c0_i32, %c0_i32_0 : i32, i32
  }
  func.func @transform_12(%arg0: i32) -> (i32, i32) {
    %c0_i32 = arith.constant 0 : i32
    %c0_i32_0 = arith.constant 0 : i32
    %c0_i32_1 = arith.constant 0 : i32
    return %c0_i32, %c0_i32_0 : i32, i32
  }
  func.func @transform_13(%arg0: i32) -> (i32, i32, i32) {
    %c0_i32 = arith.constant 0 : i32
    %c0_i32_0 = arith.constant 0 : i32
    %c0_i32_1 = arith.constant 0 : i32
    return %arg0, %c0_i32, %c0_i32_0 : i32, i32, i32
  }
}

</mosaic_0001>

<bundles_post_ra>
// kernel: tpu_custom_call.1
= control target key start
LH: loop header
LB: loop body
LE: loop exit
PB: predicated region body
PF: predicated region fallthrough
CT: control target
= control target key end

     0   :  { %18 = vsyncpa [#allocation3], 0  ;;  %s2835_s0 = inlined_call_operand.hbm [shape: f32[2,8,32], index: 0, kind: input, shape index: {}, may-alias: {0,13}]   ;;  %s2836_s1 = inlined_call_operand.vmem [shape: f32[1,32], index: 1, kind: input, shape index: {}]   ;;  %s2837_s2 = inlined_call_operand.vmem [shape: f32[1,32], index: 2, kind: input, shape index: {}]   ;;  %s2838_s3 = inlined_call_operand.vmem [shape: bf16[32,96], index: 3, kind: input, shape index: {}]   ;;  %s2839_s4 = inlined_call_operand.vmem [shape: f32[1,96], index: 4, kind: input, shape index: {}]   ;;  %s2840_s5 = inlined_call_operand.vmem [shape: bf16[32,32], index: 5, kind: input, shape index: {}]   ;;  %s2841_s6 = inlined_call_operand.vmem [shape: f32[1,32], index: 6, kind: input, shape index: {}]   ;;  %s2842_s7 = inlined_call_operand.vmem [shape: f32[1,32], index: 7, kind: input, shape index: {}]   ;;  %s2843_s8 = inlined_call_operand.vmem [shape: f32[1,32], index: 8, kind: input, shape index: {}]   ;;  %s2844_s9 = inlined_call_operand.vmem [shape: bf16[32,128], index: 9, kind: input, shape index: {}]   ;;  %s2845_s10 = inlined_call_operand.vmem [shape: f32[1,128], index: 10, kind: input, shape index: {}]   ;;  %s2846_s11 = inlined_call_operand.vmem [shape: bf16[128,32], index: 11, kind: input, shape index: {}]   ;;  %s2847_s12 = inlined_call_operand.vmem [shape: f32[1,32], index: 12, kind: input, shape index: {}]   ;;  %s2848_s13 = inlined_call_operand.hbm [shape: f32[2,8,32], index: 13, kind: output, shape index: {}, may-alias: {0,13}]  }
   0x1   :  { %20 = vsyncpa [#allocation3 + $0x1], 0 }
   0x2   :  { %21 = vsyncpa [#allocation4], 0 }
   0x3   :  { %23 = vsyncpa [#allocation4 + $0x1], 0  ;;  %s2404_s25 = smov 0   ;;  %s2406_s26 = smov 0  }
   0x4   :  { %s2408_s27 = smov 0   ;;  %s2410_s28 = smov 0  }
   0x5 LB: > { %2854 = sst [smem:[#allocation8_spill]] %s2306_s25  ;;  %s2425_s29 = sadd.s32 4294967295, %s2318_s28   ;;  %s2318_s28 = sphi %s2410_s28, %s2869_s28   ;;  %s2314_s27 = sphi %s2408_s27, %s2871_s27   ;;  %s2310_s26 = sphi %s2406_s26, %s2873_s26   ;;  %s2306_s25 = sphi %s2404_s25, %s2872_s25  }
   0x6   : > { %2855 = sst [smem:[#allocation9_spill]] %s2314_s27  ;;  %s1949_s30 = sadd.s32 4294967294, %s2318_s28  }
   0x7   : > { %s2429_s14 = sadd.s32 1, %s2318_s28   ;;  %s36_s15 = sadd.s32 1, %s2314_s27 }
   0x8   : > { %2856 = sst [smem:[#allocation10_spill]] %s2429_s14  ;;  %s33_s16 = ssub.s32 %s2318_s28, %s2429_s14 }
   0x9   : > { %p43_p0 = scmp.ne.s32.totalorder %s2314_s27, %s2310_s26  ;;  %p34_p1 = scmp.eq.s32.totalorder %s33_s16, 0 }
   0xa   : > { %p44_p2 = scmp.eq.s32.totalorder %s2318_s28, 0  ;;  %p49_p3 = scmp.ne.s32.totalorder %s2310_s26, %s2306_s25 }
   0xb   : > { %p50_p4 = scmp.eq.s32.totalorder %s2425_s29, 0  ;;  %p325_p7 = scmp.eq.s32.totalorder %s2425_s29, 1 }
   0xc   : > { %s2441_s17 = scalar_select %p34_p1, %s2314_s27, %s36_s15  }
   0xd   : > { %p2443_p5 = por %p44_p2, %p43_p0  ;;  %p2447_p6 = por %p50_p4, %p49_p3 }
   0xe   : > { %2857 = sst [smem:[#allocation11_spill]] %s2441_s17  ;;  %p331_p8 = scmp.eq.s32.totalorder %s1949_s30, 1 }
   0xf   : > { %p2140_p10 = scmp.lt.s32.totalorder %s2318_s28, 2  ;;  %p2454_p11 = por %p325_p7, %p43_p0 }
  0x10   : > { %p2458_p12 = por %p331_p8, %p49_p3  ;;  %s387_s22 = sand.u32 1, %s2314_s27  }
  0x11   : > { %s2860_s20 = scalar_select %p2454_p11, 1, 0 }
  0x12   : > { %s2861_s21 = scalar_select %p2458_p12, 1, 0 }
  0x13   : > { %s1953_s23 = sshll.u32 %s2318_s28, 7  ;;  %s1952_s24 = sshll.u32 %s387_s22, 3 }
  0x14   : > { %s2467_s17 = scalar_lea.hbm %s2835_s0, %s1953_s23  ;;  %s391_s30 = scalar_lea.vmem [#allocation2], %s1952_s24 }
  0x15   : > { %s398_s14 = sshll.u32 %s391_s30, 4  ;;  %p2471_p13 = pnand %p2140_p10, %p2443_p5  ;;  %s2475_s14 = int_to_ptr.vmem [resolvable:$true] %s398_s14 }
  0x16   : > { %s388_s15 = scalar_lea.sflag [#allocation3], %s387_s22  ;;  %s2222_s23 = scalar_lea.hbm %s2467_s17, 128 }
  0x17   : > { %p2223_p2 = scmp.ne.s32.totalorder %s2467_s17, %s2222_s23  ;;  %p2224_p3 = pneg %p2471_p13 }
  0x18   : > { %s2227_s16 = scalar_lea.hbm %s2835_s0, 256  ;;  %p2228_p5 = scmp.lt.u32.totalorder %s2467_s17, %s2835_s0 }
  0x19   : > { %p2225_p4 = pnand %p2224_p3, %p2223_p2  ;;  %p2229_p8 = scmp.lt.u32.totalorder %s2227_s16, %s2222_s23 }
  0x1a   : > { %p2231_p9 = scmp.lt.u32.totalorder %s2222_s23, %s2467_s17 }
  0x1b   : > { %p2226_p7 = pneg %p2225_p4  ;;  %p2230_p10 = por %p2229_p8, %p2228_p5 }
  0x1d   : > { %p2232_p0 = por %p2231_p9, %p2230_p10 }
  0x1f   : > { %p2233_p1 = pnand %p2232_p0, %p2226_p7 }
  0x21   : > { %2236 = shalt.err (!%p2233_p1)
}
  0x22   : > { %s2237_s22 = scalar_lea.vmem %s2475_s14, 128  ;;  %s2320_s18 = smov [#allocation2]  }
  0x23   : > { %p2238_p2 = scmp.ne.s32.totalorder %s2475_s14, %s2237_s22  ;;  %s2242_s24 = sshll.u32 %s2320_s18, 4  ;;  %s2243_s24 = int_to_ptr.vmem [resolvable:$false] %s2242_s24 }
  0x24   : > { %s2244_s27 = scalar_lea.vmem %s2243_s24, 256  ;;  %p2245_p11 = scmp.lt.s32.totalorder %s2475_s14, %s2243_s24 }
  0x25   : > { %p2240_p4 = pnand %p2238_p2, %p2224_p3  ;;  %p2246_p5 = scmp.lt.s32.totalorder %s2244_s27, %s2237_s22 }
  0x27   : > { %p2241_p12 = pneg %p2240_p4  ;;  %p2247_p8 = por %p2246_p5, %p2245_p11 }
  0x29   : > { %p2248_p9 = pnand %p2247_p8, %p2241_p12 }
  0x2b   : > { %2251 = shalt.err (!%p2248_p9)
}
  0x2c   : > { %2135 = dma.hbm_to_vmem [thread:$0]  (!%p2471_p13), %s2467_s17, 128, %s2475_s14, %s388_s15  }
  0x2d   : > { %p2863_p0 = scmp.lt.s32.totalorder %s2318_s28, 3  ;;  %p2864_p1 = scmp.ge.s32.totalorder %s2318_s28, 1 }
  0x2f   : > { %p404_p3 = pnand %p2864_p1, %p2863_p0 }
  0x30   : > { %s2509_s23 = sand.u32 (!%p404_p3), 1, %s2310_s26  }
  0x31   : > { %407 = sbr.rel (%p404_p3) target bundleno = 2788 (0xae4), region = 72  ;;  %s1955_s16 = sshll.u32 (!%p404_p3), %s2509_s23, 3 }
  0x32   : > { %s410_s30 = scalar_lea.sflag (!%p404_p3), [#allocation3], %s2509_s23  ;;  %s413_s25 = scalar_lea.vmem (!%p404_p3), [#allocation2], %s1955_s16 }
  0x38   : > { %2297 = dma.done.wait (%p2447_p6), %s410_s30, 128  }
  0x39   : > { %2299 = vsyncadd (%p2447_p6), %s410_s30, 4294967168  ;;  %vm460_vm0 = vcmask 261120   ;;  %v2519_v0 = vld [vmem:[%s413_s25] sm:$0xff]  ;;  %v2321_v8 = vmov 0.0   ;;  %vm2322_vm1 = vmmov 0   ;;  %s2323_s14 = smov 104   ;;  %v571_v31 = vlaneseq }
  0x3a   : > { %v461_v1 = vsel %vm460_vm0, %v2519_v0, 0.0  ;;  %v2186_v7 = vld [vmem:[%s2838_s3] sm:$0xff]   ;;  %2036 = vmatprep.subr.bf16.mxu0 %v2321_v8  ;;  %2040 = vmatprep.mubr.msk.bf16.mxu0 %vm2322_vm1, %v2321_v8  ;;  %v2187_v9 = vld [vmem:[%s2838_s3 + $0x8] sm:$0xff]   ;;  %s2324_s17 = smov 120   ;;  %s2325_s19 = smov 112   ;;  %vm1006_vm2 = vcmask 64512  }
  0x3b   : > { %462 = vadd.xlane.f32.xlu0 %v461_v1  ;;  %2037 = vmatpush3.bf16.msra.mxu0 %v2186_v7  ;;  %v1957_v14 = vld [vmem:[%s2836_s1] ss:$0 sm:$0xff]  ;;  %s2326_s15 = smov 96   ;;  %v2327_v29 = vmov 1983009808   ;;  %v572_v33 = vshrl.u32 %v571_v31, 7 }
  0x3c   : > { %2056 = vmatprep.subr.bf16.mxu1 %v2321_v8  ;;  %2038 = vmatprep.subr.bf16.mxu0 %v2321_v8  ;;  %v1958_v16 = vld [vmem:[%s2837_s2] ss:$0 sm:$0xff]  ;;  %v569_v30 = vunpack.c.l.s4 %v2327_v29  ;;  %v2328_v35 = vmov 1934713408   ;;  %s2329_s22 = smov 64   ;;  %vm1246_vm3 = vcmask 1043456  }
  0x3d   : > { %2058 = vmatprep.mubr.msk.bf16.mxu1 %vm2322_vm1, %v2321_v8  ;;  %v1959_v20 = vld [vmem:[%s2839_s4] ss:$0 sm:$0xff]  ;;  %v601_v36 = vunpack.c.l.s4 %v2328_v35  ;;  %s2330_s25 = smov 16   ;;  %vm1577_vm4 = vcmask 130048   ;;  %vm1579_vm5 = vcmask 195584   ;;  %p2865_p11 = scmp.ne.s32.totalorder %s2860_s20, 0 }
  0x3e   : > { %v570_v32 = vunpack.c.0.s8 %v569_v30  ;;  %s2333_s30 = smov [#allocation5]  }
  0x3f   : > { %2039 = vmatpush3.bf16.msra.mxu0 %v2187_v9  ;;  %v602_v43 = vunpack.c.0.s8 %v601_v36 }
  0x40   : > { %2044 = vmatprep.subr.bf16.mxu0 %v2321_v8  ;;  %v2570_v39 = vsub.s32 %v570_v32, %v572_v33 }
  0x41   : > { %v2580_v49 = vsub.s32 %v602_v43, %v572_v33 }
  0xc8   : > { %v463_v2 = vpop.xlane.xlu0 %462 }
  0xc9   : > { %v465_v3 = vmul.f32 0.03125, %v463_v2 }
  0xcb   : > { %v466_v4 = vsub.f32 %v2519_v0, %v465_v3 }
  0xcd   : > { %v467_v5 = vmul.f32 %v466_v4, %v466_v4 }
  0xcf   : > { %v468_v6 = vsel %vm460_vm0, %v467_v5, 0.0 }
  0xd0   : > { %469 = vadd.xlane.f32.xlu0 %v468_v6 }
 0x15d   : > { %v470_v10 = vpop.xlane.xlu0 %469 }
 0x15e   : > { %v471_v11 = vmul.f32 0.03125, %v470_v10 }
 0x160   : > { %v472_v12 = vadd.f32 1e-05, %v471_v11 }
 0x162   : > { %2200 = vrsqrt.f32 %v472_v12 }
 0x16c   : > { %v2201_v13 = vpop.eup %2200 }
 0x16d   : > { %v474_v15 = vmul.f32 %v2201_v13, %v466_v4 }
 0x16f   : > { %v481_v17 = vmul.f32 %v1957_v14, %v474_v15 }
 0x171   : > { %v488_v18 = vadd.f32 %v1958_v16, %v481_v17 }
 0x173   : > { %v489_v19 = vpack.c.bf16 %v488_v18, %v488_v18 }
 0x175   : > { %2041 = vmatmul.mubr.msk.bf16.vlgmr.msra.gmra.mrb[0].mxu0 %vm460_vm0, %v489_v19 }
 0x176   : > { %2046 = vmatprep.mubr.msk.bf16.mxu0 %vm2322_vm1, %v2321_v8 }
 0x248   : > { %v550_v21 = vpop.f32.mrb[0].mxu0 }
 0x249   : > { %v2551_v22 = vadd.f32 %v1959_v20, %v550_v21  ;;  %v2042_v23 = vpop.f32.mrb[1].mxu0 }
 0x24a   : > { %v553_v24 = vpop.f32.mrb[2].mxu0 }
 0x24b   : > { %563 = vrot.lane.b32.xlu0 %v2551_v22, %s2323_s14  ;;  %557 = vrot.lane.b32.xlu1 %v2551_v22, %s2324_s17  ;;  %v2043_v25 = vpop.f32.mrb[3].mxu0  ;;  %s2331_s14 = smov 8   ;;  %s2332_s17 = smov 24  }
 0x24f   : > { %560 = vrot.lane.b32.xlu1 %v2551_v22, %s2325_s19  ;;  %s1999_s19 = sshll.u32 %s2425_s29, 7  ;;  %s1866_s29 = scalar_lea.sflag [#allocation4], %s2509_s23 }
 0x250   : > { %s2790_s27 = scalar_lea.hbm %s2848_s13, %s1999_s19 }
 0x253   : > { %702 = vrot.lane.b32.xlu1 %v2551_v22, %s2326_s15 }
 0x2bd   : > { %v2557_v26 = vpop.permute.xlu1 %557  ;;  %v2563_v28 = vpop.permute.xlu0 %563 }
 0x2be   : > { %704 = vrot.lane.b32.xlu1 %v2557_v26, %s2326_s15  ;;  %v582_v40 = vcombine.low %v2557_v26, %v2563_v28  ;;  %v583_v41 = vcombine.high %v2557_v26, %v2563_v28 }
 0x2c0   : > { %v590_v46 = vrot.slane %v582_v40, %v2570_v39  ;;  %v597_v47 = vrot.slane %v583_v41, %v2570_v39 }
 0x2c1   : > { %v2560_v27 = vpop.permute.xlu1 %560 }
 0x2c2   : > { %706 = vrot.lane.b32.xlu1 %v2560_v27, %s2326_s15  ;;  %v566_v37 = vcombine.low %v2551_v22, %v2560_v27  ;;  %v567_v38 = vcombine.high %v2551_v22, %v2560_v27 }
 0x2c4   : > { %v574_v44 = vrot.slane %v566_v37, %v2570_v39  ;;  %v581_v45 = vrot.slane %v567_v38, %v2570_v39 }
 0x2c5   : > { %v703_v34 = vpop.permute.xlu1 %702 }
 0x2c6   : > { %708 = vrot.lane.b32.xlu1 %v2563_v28, %s2326_s15  ;;  %v598_v50 = vcombine.low %v574_v44, %v590_v46  ;;  %v599_v51 = vcombine.high %v574_v44, %v590_v46  ;;  %v614_v52 = vcombine.low %v581_v45, %v597_v47  ;;  %v615_v53 = vcombine.high %v581_v45, %v597_v47  ;;  %s455_s15 = scalar_lea.vmem [#allocation5], %s1955_s16 }
 0x2c8   : > { %v606_v59 = vrot.slane %v598_v50, %v2580_v49  ;;  %v613_v60 = vrot.slane %v599_v51, %v2580_v49  ;;  %v622_v61 = vrot.slane %v614_v52, %v2580_v49  ;;  %v629_v62 = vrot.slane %v615_v53, %v2580_v49 }
 0x2ca   : > { %v634_v9 = vcombine.low %v606_v59, %v613_v60  ;;  %v1963_v10 = vcombine.high %v606_v59, %v613_v60  ;;  %v650_v11 = vcombine.low %v622_v61, %v629_v62  ;;  %v1964_v12 = vcombine.high %v622_v61, %v629_v62 }
 0x2cc   : > { %v641_v21 = vrot.slane %v634_v9, %v2570_v39  ;;  %v649_v23 = vrot.slane %v1963_v10, %v2570_v39  ;;  %v657_v24 = vrot.slane %v650_v11, %v2570_v39  ;;  %v665_v25 = vrot.slane %v1964_v12, %v2570_v39 }
 0x2ce   : > { %v666_v37 = vcombine.low %v641_v21, %v649_v23  ;;  %v682_v38 = vcombine.low %v657_v24, %v665_v25  ;;  %v667_v40 = vcombine.high %v641_v21, %v649_v23  ;;  %v683_v41 = vcombine.high %v657_v24, %v665_v25 }
 0x2d0   : > { %v690_v50 = vrot.slane %v682_v38, %v2580_v49  ;;  %v681_v53 = vrot.slane %v667_v40, %v2580_v49 }
 0x330   : > { %v705_v42 = vpop.permute.xlu1 %704 }
 0x334   : > { %v707_v48 = vpop.permute.xlu1 %706 }
 0x335   : > { %v714_v54 = vcombine.low %v703_v34, %v707_v48  ;;  %v715_v55 = vcombine.high %v703_v34, %v707_v48  ;;  %v674_v48 = vrot.slane %v666_v37, %v2580_v49 }
 0x337   : > { %v722_v63 = vrot.slane %v714_v54, %v2570_v39  ;;  %v729_v1 = vrot.slane %v715_v55, %v2570_v39  ;;  %v697_v54 = vrot.slane %v683_v41, %v2580_v49 }
 0x338   : > { %v709_v56 = vpop.permute.xlu1 %708 }
 0x339   : > { %v730_v57 = vcombine.low %v705_v42, %v709_v56  ;;  %v731_v58 = vcombine.high %v705_v42, %v709_v56  ;;  %v700_v59 = vcombine.low %v681_v53, %v697_v54 }
 0x33b   : > { %v738_v2 = vrot.slane %v730_v57, %v2570_v39  ;;  %v745_v3 = vrot.slane %v731_v58, %v2570_v39  ;;  %v698_v58 = vcombine.low %v674_v48, %v690_v50  ;;  %v1000_v62 = vpack.c.bf16 %v700_v59, %v700_v59 }
 0x33d   : > { %v746_v4 = vcombine.low %v722_v63, %v738_v2  ;;  %v747_v5 = vcombine.high %v722_v63, %v738_v2  ;;  %v762_v6 = vcombine.low %v729_v1, %v745_v3  ;;  %v763_v7 = vcombine.high %v729_v1, %v745_v3 }
 0x33e   : > { %v998_v61 = vpack.c.bf16 %v698_v58, %v698_v58  ;;  %v699_v2 = vcombine.high %v674_v48, %v690_v50 }
 0x33f   : > { %v754_v13 = vrot.slane %v746_v4, %v2580_v49  ;;  %v761_v14 = vrot.slane %v747_v5, %v2580_v49  ;;  %v770_v15 = vrot.slane %v762_v6, %v2580_v49  ;;  %v777_v16 = vrot.slane %v763_v7, %v2580_v49 }
 0x340   : > { %v999_v4 = vpack.c.bf16 %v699_v2, %v699_v2  ;;  %v701_v6 = vcombine.high %v681_v53, %v697_v54 }
 0x341   : > { %v782_v17 = vcombine.low %v754_v13, %v761_v14  ;;  %v1965_v18 = vcombine.high %v754_v13, %v761_v14  ;;  %v798_v19 = vcombine.low %v770_v15, %v777_v16  ;;  %v1966_v20 = vcombine.high %v770_v15, %v777_v16 }
 0x342   : > { %v1001_v7 = vpack.c.bf16 %v701_v6, %v701_v6 }
 0x343   : > { %v789_v29 = vrot.slane %v782_v17, %v2570_v39  ;;  %v797_v30 = vrot.slane %v1965_v18, %v2570_v39  ;;  %v805_v31 = vrot.slane %v798_v19, %v2570_v39  ;;  %v813_v32 = vrot.slane %v1966_v20, %v2570_v39 }
 0x345   : > { %v814_v33 = vcombine.low %v789_v29, %v797_v30  ;;  %v830_v34 = vcombine.low %v805_v31, %v813_v32  ;;  %v815_v35 = vcombine.high %v789_v29, %v797_v30  ;;  %v831_v36 = vcombine.high %v805_v31, %v813_v32 }
 0x347   : > { %v822_v42 = vrot.slane %v814_v33, %v2580_v49  ;;  %v838_v43 = vrot.slane %v830_v34, %v2580_v49  ;;  %v829_v44 = vrot.slane %v815_v35, %v2580_v49  ;;  %v845_v45 = vrot.slane %v831_v36, %v2580_v49 }
 0x349   : > { %v846_v46 = vcombine.low %v822_v42, %v838_v43  ;;  %v848_v47 = vcombine.low %v829_v44, %v845_v45  ;;  %v847_v57 = vcombine.high %v822_v42, %v838_v43  ;;  %v849_v1 = vcombine.high %v829_v44, %v845_v45 }
 0x34b   : > { %v1002_v51 = vpack.c.bf16 %v846_v46, %v846_v46  ;;  %v1004_v52 = vpack.c.bf16 %v848_v47, %v848_v47  ;;  %v1003_v60 = vpack.c.bf16 %v847_v57, %v847_v57  ;;  %v1005_v3 = vpack.c.bf16 %v849_v1, %v849_v1 }
 0x34d   : > { %v1011_v55 = vsel %vm1006_vm2, %v1002_v51, 0  ;;  %v1103_v56 = vsel %vm1006_vm2, %v1004_v52, 0  ;;  %v1057_v63 = vsel %vm1006_vm2, %v1003_v60, 0  ;;  %v1149_v5 = vsel %vm1006_vm2, %v1005_v3, 0 }
 0x34e   : > { %2045 = vmatpush3.bf16.xpose.msra.mxu0 %v1011_v55  ;;  %2057 = vmatpush3.bf16.xpose.msra.mxu1 %v1103_v56 }
 0x34f   : > { %2050 = vmatprep.subr.bf16.mxu0 %v2321_v8  ;;  %2068 = vmatprep.subr.bf16.mxu1 %v2321_v8 }
 0x355   : > { %2047 = vmatmul.mubr.msk.bf16.vlgmr.msra.gmra.mrb[4].mxu0 %vm1006_vm2, %v998_v61  ;;  %2059 = vmatmul.mubr.msk.bf16.vlgmr.msra.gmra.mrb[0].mxu1 %vm1006_vm2, %v1000_v62 }
 0x356   : > { %2051 = vmatpush3.bf16.xpose.msra.mxu0 %v1057_v63  ;;  %2052 = vmatprep.mubr.msk.bf16.mxu0 %vm2322_vm1, %v2321_v8 }
 0x357   : > { %2062 = vmatprep.subr.bf16.mxu0 %v2321_v8  ;;  %2070 = vmatprep.mubr.msk.bf16.mxu1 %vm2322_vm1, %v2321_v8 }
 0x35d   : > { %2053 = vmatmul.mubr.msk.bf16.vlgmr.msra.gmra.mrb[8].mxu0 %vm1006_vm2, %v999_v4 }
 0x35e   : > { %2063 = vmatpush3.bf16.xpose.msra.mxu0 %v1149_v5  ;;  %2064 = vmatprep.mubr.msk.bf16.mxu0 %vm2322_vm1, %v2321_v8 }
 0x35f   : > { %2074 = vmatprep.subr.bf16.mxu0 %v2321_v8 }
 0x365   : > { %2065 = vmatmul.mubr.msk.bf16.vlgmr.msra.gmra.mrb[12].mxu0 %vm1006_vm2, %v1001_v7 }
 0x366   : > { %2076 = vmatprep.mubr.msk.bf16.mxu0 %vm2322_vm1, %v2321_v8 }
 0x428   : > { %v1047_v9 = vpop.f32.mrb[4].mxu0  ;;  %v1139_v10 = vpop.f32.mrb[0].mxu1 }
 0x429   : > { %v2048_v11 = vpop.f32.mrb[5].mxu0  ;;  %v2060_v12 = vpop.f32.mrb[1].mxu1  ;;  %v1191_v13 = vsel %vm1006_vm2, %v1047_v9, -inf  ;;  %v1197_v18 = vsel %vm1006_vm2, %v1139_v10, -inf }
 0x42a   : > { %v1142_v14 = vpop.f32.mrb[2].mxu1  ;;  %1192 = vmax.xlane.f32.xlu1 %v1191_v13  ;;  %v1050_v15 = vpop.f32.mrb[6].mxu0 }
 0x42b   : > { %v2049_v16 = vpop.f32.mrb[7].mxu0  ;;  %v2061_v17 = vpop.f32.mrb[3].mxu1 }
 0x42e   : > { %1198 = vmax.xlane.f32.xlu1 %v1197_v18 }
 0x430   : > { %v1093_v19 = vpop.f32.mrb[8].mxu0 }
 0x431   : > { %v2054_v20 = vpop.f32.mrb[9].mxu0  ;;  %v1194_v21 = vsel %vm1006_vm2, %v1093_v19, -inf }
 0x432   : > { %1195 = vmax.xlane.f32.xlu0 %v1194_v21  ;;  %v1096_v23 = vpop.f32.mrb[10].mxu0 }
 0x433   : > { %v2055_v24 = vpop.f32.mrb[11].mxu0 }
 0x438   : > { %v1185_v25 = vpop.f32.mrb[12].mxu0 }
 0x439   : > { %v2066_v29 = vpop.f32.mrb[13].mxu0  ;;  %v1200_v30 = vsel %vm1006_vm2, %v1185_v25, -inf }
 0x43a   : > { %1201 = vmax.xlane.f32.xlu0 %v1200_v30  ;;  %v1188_v31 = vpop.f32.mrb[14].mxu0 }
 0x43b   : > { %v2067_v32 = vpop.f32.mrb[15].mxu0 }
 0x43f   : > { %850 = vrot.lane.b32.xlu1 %v2551_v22, %s2329_s22 }
 0x4b7   : > { %v1193_v33 = vpop.xlane.xlu1 %1192 }
 0x4b8   : > { %v1203_v34 = vsub.f32 %v1047_v9, %v1193_v33 }
 0x4ba   : > { %v1207_v35 = vmul.f32 1.442695, %v1203_v34 }
 0x4bb   : > { %v1199_v45 = vpop.xlane.xlu1 %1198 }
 0x4bc   : > { %2202 = vpow2.f32 %v1207_v35  ;;  %v1205_v46 = vsub.f32 %v1139_v10, %v1199_v45 }
 0x4be   : > { %v1211_v48 = vmul.f32 1.442695, %v1205_v46 }
 0x4bf   : > { %v1196_v36 = vpop.xlane.xlu0 %1195 }
 0x4c0   : > { %v1204_v37 = vsub.f32 %v1093_v19, %v1196_v36 }
 0x4c2   : > { %v1209_v38 = vmul.f32 1.442695, %v1204_v37 }
 0x4c4   : > { %2204 = vpow2.f32 %v1209_v38 }
 0x4c6   : > { %v2635_v40 = vpop.eup %2202 }
 0x4c7   : > { %v1215_v41 = vsel %vm1006_vm2, %v2635_v40, 0.0  ;;  %v1202_v22 = vpop.xlane.xlu0 %1201 }
 0x4c8   : > { %1216 = vadd.xlane.f32.xlu1 %v1215_v41  ;;  %v1206_v44 = vsub.f32 %v1185_v25, %v1202_v22 }
 0x4ca   : > { %v1213_v47 = vmul.f32 1.442695, %v1206_v44 }
 0x4cc   : > { %2206 = vpow2.f32 %v1213_v47 }
 0x4cd   : > { %2208 = vpow2.f32 %v1211_v48 }
 0x4ce   : > { %v2639_v42 = vpop.eup %2204 }
 0x4cf   : > { %v1218_v43 = vsel %vm1006_vm2, %v2639_v42, 0.0 }
 0x4d0   : > { %1219 = vadd.xlane.f32.xlu0 %v1218_v43 }
 0x4d6   : > { %v2646_v50 = vpop.eup %2206 }
 0x4d7   : > { %v1224_v51 = vsel %vm1006_vm2, %v2646_v50, 0.0  ;;  %v2650_v52 = vpop.eup %2208 }
 0x4d9   : > { %854 = vrot.lane.b32.xlu1 %v2560_v27, %s2329_s22  ;;  %v1221_v27 = vsel %vm1006_vm2, %v2650_v52, 0.0 }
 0x4dd   : > { %856 = vrot.lane.b32.xlu1 %v2563_v28, %s2329_s22 }
 0x4e6   : > { %852 = vrot.lane.b32.xlu0 %v2557_v26, %s2329_s22  ;;  %v851_v26 = vpop.permute.xlu1 %850  ;;  %s1879_s22 = sshll.u32 %s455_s15, 4  ;;  %s2792_s22 = int_to_ptr.vmem [resolvable:$true] %s1879_s22 }
 0x4e7   : > { %s2252_s16 = scalar_lea.vmem %s2792_s22, 128 }
 0x4e8   : > { %p2253_p6 = scmp.ne.s32.totalorder %s2792_s22, %s2252_s16 }
 0x4ea   : > { %p2254_p12 = pnand %p2253_p6, %p2865_p11 }
 0x4ec   : > { %p2255_p13 = pneg %p2254_p12 }
 0x501   : > { %1225 = vadd.xlane.f32.xlu1 %v1224_v51 }
 0x505   : > { %1222 = vadd.xlane.f32.xlu0 %v1221_v27 }
 0x555   : > { %v1217_v28 = vpop.xlane.xlu1 %1216 }
 0x556   : > { %2210 = vrcp.f32 %v1217_v28 }
 0x559   : > { %v855_v53 = vpop.permute.xlu1 %854 }
 0x55a   : > { %v862_v55 = vcombine.low %v851_v26, %v855_v53  ;;  %v863_v56 = vcombine.high %v851_v26, %v855_v53 }
 0x55c   : > { %v870_v61 = vrot.slane %v862_v55, %v2570_v39  ;;  %v877_v62 = vrot.slane %v863_v56, %v2570_v39 }
 0x55d   : > { %v1220_v54 = vpop.xlane.xlu0 %1219  ;;  %v857_v57 = vpop.permute.xlu1 %856 }
 0x55e   : > { %2212 = vrcp.f32 %v1220_v54 }
 0x560   : > { %v2211_v24 = vpop.eup %2210 }
 0x561   : > { %v853_v58 = vpop.permute.xlu0 %852  ;;  %v1231_v37 = vmul.f32 %v2211_v24, %v2635_v40 }
 0x562   : > { %v878_v59 = vcombine.low %v853_v58, %v857_v57  ;;  %v879_v60 = vcombine.high %v853_v58, %v857_v57 }
 0x563   : > { %v1235_v47 = vpack.c.bf16 %v1231_v37, %v1231_v37 }
 0x564   : > { %v886_v63 = vrot.slane %v878_v59, %v2570_v39  ;;  %v893_v1 = vrot.slane %v879_v60, %v2570_v39 }
 0x566   : > { %v894_v2 = vcombine.low %v870_v61, %v886_v63  ;;  %v895_v3 = vcombine.high %v870_v61, %v886_v63  ;;  %v910_v4 = vcombine.low %v877_v62, %v893_v1  ;;  %v911_v5 = vcombine.high %v877_v62, %v893_v1 }
 0x568   : > { %v902_v6 = vrot.slane %v894_v2, %v2580_v49  ;;  %v909_v7 = vrot.slane %v895_v3, %v2580_v49  ;;  %v918_v9 = vrot.slane %v910_v4, %v2580_v49  ;;  %v925_v10 = vrot.slane %v911_v5, %v2580_v49  ;;  %v2213_v32 = vpop.eup %2212 }
 0x569   : > { %v1232_v38 = vmul.f32 %v2213_v32, %v2639_v42 }
 0x56a   : > { %v930_v11 = vcombine.low %v902_v6, %v909_v7  ;;  %v1967_v12 = vcombine.high %v902_v6, %v909_v7  ;;  %v946_v13 = vcombine.low %v918_v9, %v925_v10  ;;  %v1968_v14 = vcombine.high %v918_v9, %v925_v10 }
 0x56b   : > { %v1236_v48 = vpack.c.bf16 %v1232_v38, %v1232_v38 }
 0x56c   : > { %v937_v15 = vrot.slane %v930_v11, %v2570_v39  ;;  %v945_v16 = vrot.slane %v1967_v12, %v2570_v39  ;;  %v953_v17 = vrot.slane %v946_v13, %v2570_v39  ;;  %v961_v18 = vrot.slane %v1968_v14, %v2570_v39 }
 0x56e   : > { %v962_v19 = vcombine.low %v937_v15, %v945_v16  ;;  %v978_v20 = vcombine.low %v953_v17, %v961_v18  ;;  %v963_v21 = vcombine.high %v937_v15, %v945_v16  ;;  %v979_v23 = vcombine.high %v953_v17, %v961_v18  ;;  %v2188_v17 = vld [vmem:[%s2840_s5] sm:$0xff]  }
 0x570   : > { %v970_v25 = vrot.slane %v962_v19, %v2580_v49  ;;  %v986_v29 = vrot.slane %v978_v20, %v2580_v49  ;;  %v977_v30 = vrot.slane %v963_v21, %v2580_v49  ;;  %v993_v31 = vrot.slane %v979_v23, %v2580_v49 }
 0x572   : > { %v994_v33 = vcombine.low %v970_v25, %v986_v29  ;;  %v995_v34 = vcombine.high %v970_v25, %v986_v29  ;;  %v996_v35 = vcombine.low %v977_v30, %v993_v31  ;;  %v997_v36 = vcombine.high %v977_v30, %v993_v31  ;;  %v2189_v30 = vld [vmem:[%s2840_s5 + $0x8] sm:$0xff]  }
 0x574   : > { %v1239_v41 = vpack.c.bf16 %v994_v33, %v994_v33  ;;  %v1240_v43 = vpack.c.bf16 %v995_v34, %v995_v34  ;;  %v1241_v45 = vpack.c.bf16 %v996_v35, %v996_v35  ;;  %v1242_v46 = vpack.c.bf16 %v997_v36, %v997_v36 }
 0x576   : > { %v1248_v22 = vsel %vm1246_vm3, %v1239_v41, 0  ;;  %v1294_v44 = vsel %vm1246_vm3, %v1240_v43, 0  ;;  %v1340_v40 = vsel %vm1246_vm3, %v1241_v45, 0  ;;  %v1386_v42 = vsel %vm1246_vm3, %v1242_v46, 0 }
 0x577   : > { %2069 = vmatpush3.bf16.msra.mxu1 %v1248_v22  ;;  %2075 = vmatpush3.bf16.msra.mxu0 %v1294_v44 }
 0x578   : > { %2080 = vmatprep.subr.bf16.mxu1 %v2321_v8  ;;  %2086 = vmatprep.subr.bf16.mxu0 %v2321_v8 }
 0x57a   : > { %2071 = vmatmul.mubr.msk.bf16.vlgmr.msra.gmra.mrb[4].mxu1 %vm1006_vm2, %v1235_v47  ;;  %2077 = vmatmul.mubr.msk.bf16.vlgmr.msra.gmra.mrb[16].mxu0 %vm1006_vm2, %v1236_v48 }
 0x57b   : > { %2081 = vmatpush3.bf16.msra.mxu1 %v1340_v40  ;;  %2087 = vmatpush3.bf16.msra.mxu0 %v1386_v42 }
 0x57c   : > { %2088 = vmatprep.mubr.msk.bf16.mxu0 %vm2322_vm1, %v2321_v8  ;;  %2082 = vmatprep.mubr.msk.bf16.mxu1 %vm2322_vm1, %v2321_v8 }
 0x57d   : > { %2092 = vmatprep.subr.bf16.mxu1 %v2321_v8  ;;  %2100 = vmatprep.subr.bf16.mxu0 %v2321_v8 }
 0x58e   : > { %v1226_v51 = vpop.xlane.xlu1 %1225 }
 0x58f   : > { %2214 = vrcp.f32 %v1226_v51 }
 0x592   : > { %v1223_v27 = vpop.xlane.xlu0 %1222 }
 0x593   : > { %2216 = vrcp.f32 %v1223_v27 }
 0x599   : > { %v2215_v26 = vpop.eup %2214 }
 0x59a   : > { %v1234_v28 = vmul.f32 %v2215_v26, %v2646_v50 }
 0x59c   : > { %v1238_v53 = vpack.c.bf16 %v1234_v28, %v1234_v28 }
 0x59d   : > { %v2217_v54 = vpop.eup %2216 }
 0x59e   : > { %v1233_v55 = vmul.f32 %v2217_v54, %v2650_v52  ;;  %2089 = vmatmul.mubr.msk.bf16.vlgmr.msra.gmra.mrb[20].mxu0 %vm1006_vm2, %v1238_v53 }
 0x59f   : > { %2104 = vmatprep.mubr.msk.bf16.mxu0 %vm2322_vm1, %v2321_v8 }
 0x5a0   : > { %v1237_v56 = vpack.c.bf16 %v1233_v55, %v1233_v55 }
 0x5a2   : > { %2083 = vmatmul.mubr.msk.bf16.vlgmr.msra.gmra.mrb[8].mxu1 %vm1006_vm2, %v1237_v56  ;;  %v1979_v56 = vld [vmem:[%s2841_s6] ss:$0 sm:$0xff] }
 0x5a3   : > { %2096 = vmatprep.mubr.msk.bf16.mxu1 %vm2322_vm1, %v2321_v8  ;;  %2093 = vmatpush3.bf16.msra.mxu1 %v2188_v17 }
 0x5a4   : > { %2094 = vmatprep.subr.bf16.mxu1 %v2321_v8 }
 0x5a7   : > { %2095 = vmatpush3.bf16.msra.mxu1 %v2189_v30 }
 0x5a8   : > { %2108 = vmatprep.subr.bf16.mxu1 %v2321_v8 }
 0x64d   : > { %v1284_v57 = vpop.f32.mrb[4].mxu1  ;;  %v1330_v58 = vpop.f32.mrb[16].mxu0 }
 0x64e   : > { %v2072_v59 = vpop.f32.mrb[5].mxu1  ;;  %v2078_v60 = vpop.f32.mrb[17].mxu0 }
 0x64f   : > { %v1287_v50 = vpop.f32.mrb[6].mxu1  ;;  %v1333_v61 = vpop.f32.mrb[18].mxu0 }
 0x650   : > { %v2073_v62 = vpop.f32.mrb[7].mxu1  ;;  %v2079_v63 = vpop.f32.mrb[19].mxu0 }
 0x671   : > { %v1422_v52 = vpop.f32.mrb[20].mxu0 }
 0x672   : > { %v1444_v1 = vcombine.low %v1330_v58, %v1422_v52  ;;  %v1445_v2 = vcombine.high %v1330_v58, %v1422_v52  ;;  %v2090_v3 = vpop.f32.mrb[21].mxu0 }
 0x673   : > { %v1425_v4 = vpop.f32.mrb[22].mxu0 }
 0x674   : > { %v2091_v5 = vpop.f32.mrb[23].mxu0  ;;  %v1452_v12 = vrot.slane %v1444_v1, %v2570_v39  ;;  %v1459_v13 = vrot.slane %v1445_v2, %v2570_v39  ;;  %v2190_v4 = vld [vmem:[%s2844_s9] sm:$0xff]  }
 0x675   : > { %v1376_v6 = vpop.f32.mrb[8].mxu1  ;;  %2101 = vmatpush3.bf16.msra.mxu0 %v2190_v4  ;;  %v2192_v5 = vld [vmem:[%s2846_s11] sm:$0xff]  }
 0x676   : > { %v1428_v7 = vcombine.low %v1284_v57, %v1376_v6  ;;  %v1429_v9 = vcombine.high %v1284_v57, %v1376_v6  ;;  %v2084_v10 = vpop.f32.mrb[9].mxu1  ;;  %2102 = vmatprep.subr.bf16.mxu0 %v2321_v8  ;;  %v2193_v6 = vld [vmem:[%s2846_s11 + $0x8] sm:$0xff]  }
 0x677   : > { %v1379_v11 = vpop.f32.mrb[10].mxu1 }
 0x678   : > { %v1436_v14 = vrot.slane %v1428_v7, %v2570_v39  ;;  %v1443_v15 = vrot.slane %v1429_v9, %v2570_v39  ;;  %v2085_v16 = vpop.f32.mrb[11].mxu1  ;;  %v2194_v7 = vld [vmem:[%s2846_s11 + $0x10] sm:$0xff]  }
 0x67a   : > { %v1460_v18 = vcombine.low %v1436_v14, %v1452_v12  ;;  %v1461_v19 = vcombine.high %v1436_v14, %v1452_v12  ;;  %v1476_v20 = vcombine.low %v1443_v15, %v1459_v13  ;;  %v1477_v21 = vcombine.high %v1443_v15, %v1459_v13  ;;  %v1983_v13 = vld [vmem:[%s2842_s7] ss:$0 sm:$0xff] }
 0x67b   : > { %v1984_v15 = vld [vmem:[%s2843_s8] ss:$0 sm:$0xff] }
 0x67c   : > { %v1468_v23 = vrot.slane %v1460_v18, %v2580_v49  ;;  %v1475_v24 = vrot.slane %v1461_v19, %v2580_v49  ;;  %v1484_v25 = vrot.slane %v1476_v20, %v2580_v49  ;;  %v1491_v29 = vrot.slane %v1477_v21, %v2580_v49  ;;  %v2195_v19 = vld [vmem:[%s2846_s11 + $0x18] sm:$0xff]   ;;  %v2196_v20 = vld [vmem:[%s2846_s11 + $0x20] sm:$0xff]   ;;  %v2197_v21 = vld [vmem:[%s2846_s11 + $0x28] sm:$0xff]  }
 0x67e   : > { %v1496_v31 = vcombine.low %v1468_v23, %v1475_v24  ;;  %v1977_v32 = vcombine.high %v1468_v23, %v1475_v24  ;;  %v1512_v33 = vcombine.low %v1484_v25, %v1491_v29  ;;  %v1978_v34 = vcombine.high %v1484_v25, %v1491_v29  ;;  %v2198_v23 = vld [vmem:[%s2846_s11 + $0x30] sm:$0xff]   ;;  %v2199_v24 = vld [vmem:[%s2846_s11 + $0x38] sm:$0xff]   ;;  %v1985_v25 = vld [vmem:[%s2845_s10] ss:$0 sm:$0xff] }
 0x680   : > { %v1503_v35 = vrot.slane %v1496_v31, %v2570_v39  ;;  %v1511_v36 = vrot.slane %v1977_v32, %v2570_v39  ;;  %v1519_v37 = vrot.slane %v1512_v33, %v2570_v39  ;;  %v1527_v38 = vrot.slane %v1978_v34, %v2570_v39 }
 0x682   : > { %v1529_v41 = vcombine.high %v1503_v35, %v1511_v36  ;;  %v1545_v43 = vcombine.high %v1519_v37, %v1527_v38  ;;  %v1528_v22 = vcombine.low %v1503_v35, %v1511_v36  ;;  %v1544_v44 = vcombine.low %v1519_v37, %v1527_v38 }
 0x684   : > { %v1543_v45 = vrot.slane %v1529_v41, %v2580_v49  ;;  %v1559_v46 = vrot.slane %v1545_v43, %v2580_v49  ;;  %v1536_v47 = vrot.slane %v1528_v22, %v2580_v49  ;;  %v1552_v48 = vrot.slane %v1544_v44, %v2580_v49  ;;  %v1989_v41 = vld [vmem:[%s2847_s12] ss:$0 sm:$0xff] }
 0x686   : > { %v1562_v40 = vcombine.low %v1543_v45, %v1559_v46  ;;  %v1561_v42 = vcombine.high %v1536_v47, %v1552_v48  ;;  %v1563_v51 = vcombine.high %v1543_v45, %v1559_v46  ;;  %v1560_v27 = vcombine.low %v1536_v47, %v1552_v48 }
 0x688   : > { %1569 = vrot.lane.b32.xlu1 %v1562_v40, %s2330_s25  ;;  %1565 = vrot.lane.b32.xlu0 %v1561_v42, %s2331_s14  ;;  %s2256_s25 = sshll.u32 %s2333_s30, 4  ;;  %s2257_s25 = int_to_ptr.vmem [resolvable:$false] %s2256_s25 }
 0x689   : > { %s2258_s14 = scalar_lea.vmem %s2257_s25, 256  ;;  %p2259_p7 = scmp.lt.s32.totalorder %s2792_s22, %s2257_s25 }
 0x68a   : > { %p2260_p10 = scmp.lt.s32.totalorder %s2258_s14, %s2252_s16 }
 0x68c   : > { %1573 = vrot.lane.b32.xlu0 %v1563_v51, %s2332_s17  ;;  %p2261_p2 = por %p2260_p10, %p2259_p7 }
 0x68e   : > { %p2262_p4 = pnand %p2261_p2, %p2255_p13 }
 0x6fa   : > { %v1566_v39 = vpop.permute.xlu0 %1565  ;;  %v1570_v26 = vpop.permute.xlu1 %1569 }
 0x6fb   : > { %v1576_v28 = vsel %vm1006_vm2, %v1560_v27, %v1566_v39 }
 0x6fc   : > { %v1578_v54 = vsel %vm1577_vm4, %v1576_v28, %v1570_v26 }
 0x6fe   : > { %v1574_v53 = vpop.permute.xlu0 %1573 }
 0x6ff   : > { %v1580_v55 = vsel %vm1579_vm5, %v1578_v54, %v1574_v53 }
 0x700   : > { %v1581_v49 = vpack.c.bf16 %v1580_v55, %v1580_v55 }
 0x702   : > { %2097 = vmatmul.mubr.msk.bf16.vlgmr.msra.gmra.mrb[12].mxu1 %vm460_vm0, %v1581_v49 }
 0x703   : > { %2124 = vmatprep.mubr.msk.bf16.mxu1 %vm2322_vm1, %v2321_v8  ;;  %2109 = vmatpush3.bf16.msra.mxu1 %v2192_v5 }
 0x704   : > { %2110 = vmatprep.subr.bf16.mxu1 %v2321_v8 }
 0x707   : > { %2111 = vmatpush3.bf16.msra.mxu1 %v2193_v6 }
 0x708   : > { %2112 = vmatprep.subr.bf16.mxu1 %v2321_v8 }
 0x70b   : > { %2113 = vmatpush3.bf16.msra.mxu1 %v2194_v7 }
 0x70c   : > { %2114 = vmatprep.subr.bf16.mxu1 %v2321_v8 }
 0x70f   : > { %2115 = vmatpush3.bf16.msra.mxu1 %v2195_v19 }
 0x710   : > { %2116 = vmatprep.subr.bf16.mxu1 %v2321_v8 }
 0x713   : > { %2117 = vmatpush3.bf16.msra.mxu1 %v2196_v20 }
 0x714   : > { %2118 = vmatprep.subr.bf16.mxu1 %v2321_v8 }
 0x717   : > { %2119 = vmatpush3.bf16.msra.mxu1 %v2197_v21 }
 0x718   : > { %2120 = vmatprep.subr.bf16.mxu1 %v2321_v8 }
 0x71b   : > { %2121 = vmatpush3.bf16.msra.mxu1 %v2198_v23 }
 0x71c   : > { %2122 = vmatprep.subr.bf16.mxu1 %v2321_v8 }
 0x71f   : > { %2123 = vmatpush3.bf16.msra.mxu1 %v2199_v24 }
 0x7d5   : > { %v1642_v57 = vpop.f32.mrb[12].mxu1 }
 0x7d6   : > { %v1643_v58 = vadd.f32 %v1979_v56, %v1642_v57  ;;  %v2098_v59 = vpop.f32.mrb[13].mxu1 }
 0x7d7   : > { %v1645_v60 = vpop.f32.mrb[14].mxu1 }
 0x7d8   : > { %v2726_v50 = vadd.f32 %v1643_v58, %v2519_v0  ;;  %v2099_v61 = vpop.f32.mrb[15].mxu1  ;;  %v2191_v0 = vld [vmem:[%s2844_s9 + $0x8] sm:$0xff]  }
 0x7d9   : > { %2103 = vmatpush3.bf16.msra.mxu0 %v2191_v0 }
 0x7da   : > { %v1651_v62 = vsel %vm460_vm0, %v2726_v50, 0.0 }
 0x7db   : > { %1652 = vadd.xlane.f32.xlu1 %v1651_v62 }
 0x868   : > { %v1653_v63 = vpop.xlane.xlu1 %1652 }
 0x869   : > { %v1654_v52 = vmul.f32 0.03125, %v1653_v63 }
 0x86b   : > { %v1655_v1 = vsub.f32 %v2726_v50, %v1654_v52 }
 0x86d   : > { %v1656_v2 = vmul.f32 %v1655_v1, %v1655_v1 }
 0x86f   : > { %v1657_v3 = vsel %vm460_vm0, %v1656_v2, 0.0 }
 0x870   : > { %1658 = vadd.xlane.f32.xlu0 %v1657_v3 }
 0x8fd   : > { %v1659_v9 = vpop.xlane.xlu0 %1658 }
 0x8fe   : > { %v1660_v10 = vmul.f32 0.03125, %v1659_v9 }
 0x900   : > { %v1661_v11 = vadd.f32 1e-05, %v1660_v10 }
 0x902   : > { %2218 = vrsqrt.f32 %v1661_v11 }
 0x90c   : > { %v2219_v12 = vpop.eup %2218 }
 0x90d   : > { %v1663_v14 = vmul.f32 %v2219_v12, %v1655_v1 }
 0x90f   : > { %v1670_v16 = vmul.f32 %v1983_v13, %v1663_v14 }
 0x911   : > { %v1677_v17 = vadd.f32 %v1984_v15, %v1670_v16 }
 0x913   : > { %v1678_v18 = vpack.c.bf16 %v1677_v17, %v1677_v17 }
 0x915   : > { %2105 = vmatmul.mubr.msk.bf16.vlgmr.msra.gmra.mrb[24].mxu0 %vm460_vm0, %v1678_v18 }
 0x9e8   : > { %v1739_v29 = vpop.f32.mrb[24].mxu0 }
 0x9e9   : > { %v1740_v30 = vadd.f32 %v1985_v25, %v1739_v29  ;;  %v2106_v31 = vpop.f32.mrb[25].mxu0 }
 0x9ea   : > { %v1742_v32 = vpop.f32.mrb[26].mxu0 }
 0x9eb   : > { %v1747_v33 = vmul.f32 0.70710677, %v1740_v30  ;;  %v2107_v34 = vpop.f32.mrb[27].mxu0  ;;  %v1745_v8 = vmul.f32 0.5, %v1740_v30 }
 0x9ed   : > { %2220 = verf.f32 %v1747_v33 }
 0x9f7   : > { %v2221_v35 = vpop.eup %2220 }
 0x9f8   : > { %v1749_v36 = vadd.f32 1.0, %v2221_v35 }
 0x9fa   : > { %v1750_v37 = vmul.f32 %v1749_v36, %v1745_v8 }
 0x9fc   : > { %v1751_v38 = vpack.c.bf16 %v1750_v37, %v1750_v37 }
 0x9fe   : > { %2125 = vmatmul.mubr.bf16.vlgmr.msra.gmra.mrb[16].mxu1 %v1751_v38 }
 0xad1   : > { %v1857_v43 = vpop.f32.mrb[16].mxu1 }
 0xad2   : > { %v1858_v22 = vadd.f32 %v1989_v41, %v1857_v43  ;;  %v2126_v44 = vpop.f32.mrb[17].mxu1 }
 0xad3   : > { %v1860_v45 = vpop.f32.mrb[18].mxu1 }
 0xad4   : > { %v1863_v46 = vadd.f32 %v1858_v22, %v2726_v50  ;;  %v2127_v47 = vpop.f32.mrb[19].mxu1 }
 0xad6   : > { %1864 = vst.msk [vmem:[%s455_s15] sm:$0xff] %vm460_vm0, %v1863_v46 }
 0xad7   : > { %2265 = shalt.err (!%p2262_p4)
}
 0xad8   : > { %s2266_s23 = scalar_lea.hbm %s2790_s27, 128  ;;  %s2270_s15 = scalar_lea.hbm %s2848_s13, 256 }
 0xad9   : > { %p2267_p5 = scmp.ne.s32.totalorder %s2790_s27, %s2266_s23  ;;  %p2271_p0 = scmp.lt.u32.totalorder %s2790_s27, %s2848_s13 }
 0xada   : > { %p2272_p1 = scmp.lt.u32.totalorder %s2270_s15, %s2266_s23  ;;  %p2274_p6 = scmp.lt.u32.totalorder %s2266_s23, %s2790_s27 }
 0xadb   : > { %p2268_p8 = pnand %p2267_p5, %p2865_p11 }
 0xadc   : > { %p2273_p3 = por %p2272_p1, %p2271_p0 }
 0xadd   : > { %p2269_p9 = pneg %p2268_p8 }
 0xade   : > { %p2275_p12 = por %p2274_p6, %p2273_p3 }
 0xae0   : > { %p2276_p13 = pnand %p2275_p12, %p2269_p9 }
 0xae2   : > { %2279 = shalt.err (!%p2276_p13)
}
 0xae3   : > { %2130 = dma.vmem_to_hbm [thread:$0]  (%p2865_p11), %s2792_s22, 128, %s2790_s27, %s1866_s29  }
 0xae4 PF: > { %s2866_s16 = sld [smem:[#allocation8_spill]]  ;;  %p2867_p7 = scmp.ne.s32.totalorder %s2861_s21, 0 }
 0xae5   : > { %p2868_p10 = scmp.ge.s32.totalorder %s2318_s28, 2 }
 0xae7   : > { %p2137_p2 = pnand %p2868_p10, %p2867_p7 }
 0xaea   : > { %s1891_s30 = sand.u32 1, %s2866_s16  }
 0xaeb   : > { %s1892_s25 = scalar_lea.sflag [#allocation4], %s1891_s30 }
 0xaec   : > { %2301 = dma.done.wait (!%p2137_p2), %s1892_s25, 128  }
 0xaed   : > { %2303 = vsyncadd (!%p2137_p2), %s1892_s25, 4294967168  ;;  %s2869_s28 = sld [smem:[#allocation10_spill]]  ;;  %s2870_s14 = sld [smem:[#allocation9_spill]] }
 0xaee   : > { %s2871_s27 = sld [smem:[#allocation11_spill]]  ;;  %s2872_s25 = smov %s2310_s26 }
 0xaf3   : > { %p26_p4 = scmp.ge.s32.totalorder %s2869_s28, 4   ;;  %s2873_s26 = smov %s2870_s14 }
 0xaf5   :  { %28 = sbr.rel (!%p26_p4) target bundleno = 5 (0x5), region = 117 }
 0xafc   :  { %1897 = vsyncpa [#allocation3], 1 }
 0xafd   :  { %1899 = vsyncpa [#allocation3 + $0x1], 1 }
 0xafe   :  { %1900 = vsyncpa [#allocation4], 1 }
 0xaff   :  { %1902 = vsyncpa [#allocation4 + $0x1], 1 }

</bundles_post_ra>
